<compile_context>
chip_gen: v6e
topology: v6e:2x2x1
jax: 0.10.0
libtpu: 0.0.40
codegen_flags: <defaults>
</compile_context>

<pallas_src>
import random

import numpy as np
import jax
import jax.numpy as jnp
from jax import lax
from jax.experimental import pallas as pl
from jax.experimental.pallas import tpu as pltpu


# ----------------------------- hardware-derived budgets -----------------------------

def _vmem_capacity_bytes():
    try:
        info = pltpu.get_tpu_info()
        for name in ("vmem_capacity_bytes", "vmem_bytes"):
            v = getattr(info, name, None)
            if v:
                return int(v)
    except Exception:
        pass
    return 64 * 1024 * 1024          # conservative default (v7x: 64 MiB per TensorCore)


_VMEM_CAP = _vmem_capacity_bytes()
_BIG_VMEM = _VMEM_CAP >= 96 * 1024 * 1024
_VMEM_LIMIT_BYTES = min(96 * 1024 * 1024, (_VMEM_CAP * 3) // 4)   # 96 MiB v5e/v6e, 48 MiB v7x
_BLOCK_BUDGET_BYTES = (4 if _BIG_VMEM else 2) * 1024 * 1024       # x-bytes per grid step
_PERM_MAX = 1024        # hard cap on the side of the (tl, tl) right permutation
_LEFT_PERM_MAX = 1024   # hard cap on the side of the (R, R) left permutation


# --------------------------------- kernel bodies ---------------------------------

def _exact_dot(a, b):
    # 0/1 permutation matmuls must be exact; on the f32 path force full-precision MXU
    # passes (a low-precision pass would truncate the data operand to bf16).
    prec = (lax.Precision.HIGHEST
            if (a.dtype == jnp.float32 or b.dtype == jnp.float32) else None)
    return jnp.dot(a, b, preferred_element_type=jnp.float32, precision=prec)


def _copy_kernel(x_ref, o_ref):
    # The requested flip is handled entirely by the BlockSpec index_map (pure data movement).
    o_ref[...] = x_ref[...]


def _right_kernel(rp_ref, x_ref, o_ref):
    # fine part of the H/W flip inside one lane chunk
    o_ref[...] = _exact_dot(x_ref[...], rp_ref[...]).astype(o_ref.dtype)


def _left_kernel(lp_ref, x_ref, o_ref):
    # channel flip inside one row block (whole samples per block)
    o_ref[...] = _exact_dot(lp_ref[...], x_ref[...]).astype(o_ref.dtype)


def _both_kernel(lp_ref, rp_ref, x_ref, o_ref):
    y = _exact_dot(lp_ref[...], x_ref[...]).astype(x_ref.dtype)
    o_ref[...] = _exact_dot(y, rp_ref[...]).astype(o_ref.dtype)


# ----------------------------------- planning -----------------------------------

def _divisors(n):
    ds, i = set(), 1
    while i * i <= n:
        if n % i == 0:
            ds.add(i)
            ds.add(n // i)
        i += 1
    return sorted(ds)


def _plan_lanes(H, W, flip_h, flip_w, lane_cap, tl_target):
    """Tile the flattened H*W (lane) axis into chunks of `tl` lanes.

    The coarse part of the H/W flips (whole chunks moving) goes into the input index_map;
    the fine part (inside a chunk) is at most one (tl, tl) 0/1 permutation.  `tl` is kept
    a multiple of 128 (lane-dense, unmasked stores) or equal to H*W.
    kinds: 'none'  no lane flip           (no right perm)
           'rows'  chunk = mw whole W-rows, mw | H
           'sub'   chunk = 128-aligned fraction of one W-row (tl | W), flip_w fine part inside
           'subh'  like 'sub' but flip_h only -> no right perm at all
    Returns dict(kind, tl, mw, kW) or None if no legal tiling exists.
    """
    LC = H * W
    lane_ok = lambda t: t % 128 == 0 or t == LC

    if not (flip_h or flip_w):
        tl = LC if LC <= lane_cap else max(128, (lane_cap // 128) * 128)
        return dict(kind="none", tl=tl, mw=1, kW=1)

    row_cands = [("rows", mw * W, mw, 1) for mw in _divisors(H)
                 if lane_ok(mw * W) and mw * W <= min(lane_cap, _PERM_MAX)]
    sub_divs = [t for t in _divisors(W) if t % 128 == 0 and t <= lane_cap]

    if flip_w:
        cands = row_cands + [("sub", t, 1, W // t) for t in sub_divs if t <= _PERM_MAX]
        if not cands:
            return None
        dense = [c for c in cands if c[1] >= 128] or cands
        kind, tl, mw, kW = min(dense, key=lambda c: (abs(c[1] - tl_target), -c[1]))
        return dict(kind=kind, tl=tl, mw=mw, kW=kW)

    # flip_h only: prefer tilings that need NO in-kernel permutation at all.
    noperm = []
    if lane_ok(W) and W <= lane_cap:
        noperm.append(("rows", W, 1, 1))
    noperm += [("subh", t, 1, W // t) for t in sub_divs]
    if noperm:
        kind, tl, mw, kW = max(noperm, key=lambda c: c[1])
        return dict(kind=kind, tl=tl, mw=mw, kW=kW)
    if not row_cands:
        return None
    dense = [c for c in row_cands if c[1] >= 128] or row_cands
    kind, tl, mw, kW = min(dense, key=lambda c: (abs(c[1] - tl_target), -c[1]))
    return dict(kind=kind, tl=tl, mw=mw, kW=kW)


def _plan_rows(N, C, flip_c, row_cap):
    """Tile the merged N*C row axis into blocks of R rows.

    Without flip_c: plain 8-aligned row slabs (or the full axis).  With flip_c: the block is
    a whole number of samples (R = m*C with m | N) so the channel flip is one (R, R)
    kron(I_m, anti_eye(C)) left perm that never mixes padded rows, kept modest so the left
    matmul stays under the HBM roofline.  Returns R or None.
    """
    NC = N * C
    if not flip_c:
        if NC <= max(row_cap, 8):
            return NC
        return max(8, (row_cap // 8) * 8)
    row_ok = lambda r: r % 8 == 0 or r == NC
    m_cap = max(1, row_cap // C)
    cands = [m for m in _divisors(N)
             if m <= m_cap and row_ok(m * C) and m * C <= _LEFT_PERM_MAX]
    if not cands:
        if NC <= _LEFT_PERM_MAX and NC <= 2 * max(row_cap, 8):
            return NC
        return None
    small = [m for m in cands if m * C <= max(256, C)]
    m = max(small) if small else min(cands)
    return m * C


def _make_src_chunk(plan, H, W, flip_h, flip_w):
    """index_map helper: source lane-chunk index for a destination lane-chunk index."""
    kind, mw, kW = plan["kind"], plan["mw"], plan["kW"]
    if kind == "none":
        return lambda j: j
    if kind == "rows":
        n = H // mw
        return (lambda j: n - 1 - j) if flip_h else (lambda j: j)

    def src(j):                       # 'sub' / 'subh': chunk j = h*kW + q
        h, q = j // kW, j % kW
        if flip_h:
            h = H - 1 - h
        if flip_w:
            q = kW - 1 - q
        return h * kW + q
    return src


def _right_perm(plan, W, flip_h, flip_w, dtype):
    """(tl, tl) permutation with (chunk @ P)[:, d] = chunk[:, src(d)], or None if identity."""
    kind, tl, mw = plan["kind"], plan["tl"], plan["mw"]
    if kind in ("none", "subh"):
        return None
    if kind == "rows":
        r, w = np.arange(mw), np.arange(W)
        r_src = (mw - 1 - r) if flip_h else r
        w_src = (W - 1 - w) if flip_w else w
        src = (r_src[:, None] * W + w_src[None, :]).reshape(-1)
    else:  # 'sub': fine part of the W reversal inside a 128-aligned fraction of a row
        src = np.arange(tl)[::-1]
    if np.array_equal(src, np.arange(tl)):
        return None
    P = np.zeros((tl, tl), dtype=np.float32)
    P[src, np.arange(tl)] = 1.0
    return jnp.asarray(P, dtype=dtype)


def _left_perm(R, C, dtype):
    """(R, R) left permutation kron(I_{R/C}, anti_eye(C)): (P @ block)[d, :] = block[src(d), :]."""
    d = np.arange(R)
    src = (d // C) * C + (C - 1 - d % C)
    P = np.zeros((R, R), dtype=np.float32)
    P[d, src] = 1.0
    return jnp.asarray(P, dtype=dtype)


# ------------------------------------ wrapper ------------------------------------

def mirror_flip(x, flip_w, flip_h, flip_c):
    """Pallas implementation of torch.flip(x, dims=subset of [-1, -2, -3]) for NCHW x."""
    N, C, H, W = x.shape
    flip_w = bool(flip_w) and W > 1
    flip_h = bool(flip_h) and H > 1
    flip_c = bool(flip_c) and C > 1
    if not (flip_w or flip_h or flip_c):
        return x
    axes = [a for a, f in ((-1, flip_w), (-2, flip_h), (-3, flip_c)) if f]

    if x.dtype not in (jnp.float32, jnp.bfloat16, jnp.float16):
        # TODO(synk): integer / exotic dtypes need an MXU-free in-kernel lane reversal
        # (gather / sublane mirrored copies); fall back to XLA for them.
        return jnp.flip(x, axis=axes)

    NC, LC = N * C, H * W
    item = x.dtype.itemsize
    budget = _BLOCK_BUDGET_BYTES
    lane_cap = max(128, budget // (8 * item))
    tl_target = int(np.clip(budget // (item * max(NC, 8)), 128, 512))

    lane_plan = _plan_lanes(H, W, flip_h, flip_w, lane_cap, tl_target)
    if lane_plan is None:
        # TODO(synk): shapes with no 128-aligned chunking of W (e.g. large prime W) fall
        # back to XLA rather than emitting tiny masked-store tiles.
        return jnp.flip(x, axis=axes)
    tl = lane_plan["tl"]

    row_cap = max(8, budget // (tl * item))
    R = _plan_rows(N, C, flip_c, row_cap)
    if R is None:
        return jnp.flip(x, axis=axes)

    kind, mw = lane_plan["kind"], lane_plan["mw"]
    if kind == "none":
        n_chunks = pl.cdiv(LC, tl)
    elif kind == "rows":
        n_chunks = H // mw
    else:
        n_chunks = H * (W // tl)
    n_row_blocks = pl.cdiv(NC, R)

    # v7x has 2 TensorCores: keep the parallel grid at >= 2 steps when that is free.
    if n_row_blocks * n_chunks == 1 and not flip_c and NC >= 16:
        R = max(8, (NC // 2 // 8) * 8)
        n_row_blocks = pl.cdiv(NC, R)

    pdt = jnp.bfloat16 if x.dtype == jnp.bfloat16 else jnp.float32
    right = _right_perm(lane_plan, W, flip_h, flip_w, pdt)
    left = _left_perm(R, C, pdt) if flip_c else None
    src_chunk = _make_src_chunk(lane_plan, H, W, flip_h, flip_w)

    x2 = x.reshape(NC, LC)
    in_specs, operands = [], []
    if left is not None:
        # constant operand: block index is (0, 0) every step, so Pallas DMAs it only once
        # (the perms are tile-sized now, so the default double buffer costs <~1 MiB).
        in_specs.append(pl.BlockSpec((R, R), lambda i, j: (0, 0)))
        operands.append(left)
    if right is not None:
        in_specs.append(pl.BlockSpec((tl, tl), lambda i, j: (0, 0)))
        operands.append(right)
    in_specs.append(pl.BlockSpec((R, tl), lambda i, j: (i, src_chunk(j))))
    operands.append(x2)

    if left is not None and right is not None:
        kernel = _both_kernel
    elif left is not None:
        kernel = _left_kernel
    elif right is not None:
        kernel = _right_kernel
    else:
        kernel = _copy_kernel

    flops = 0
    if left is not None:
        flops += 2 * NC * LC * R
    if right is not None:
        flops += 2 * NC * LC * tl
    perm_bytes = sum(int(np.prod(p.shape)) * p.dtype.itemsize for p in operands[:-1])
    cost = pl.CostEstimate(flops=int(flops), transcendentals=0,
                           bytes_accessed=int(2 * x.size * item + perm_bytes))

    out2 = pl.pallas_call(
        kernel,
        out_shape=jax.ShapeDtypeStruct((NC, LC), x.dtype),
        grid_spec=pltpu.PrefetchScalarGridSpec(
            num_scalar_prefetch=0,
            grid=(n_row_blocks, n_chunks),
            in_specs=in_specs,
            out_specs=pl.BlockSpec((R, tl), lambda i, j: (i, j)),
        ),
        compiler_params=pltpu.CompilerParams(
            dimension_semantics=("parallel", "parallel"),
            vmem_limit_bytes=_VMEM_LIMIT_BYTES,
        ),
        cost_estimate=cost,
    )(*operands)
    return out2.reshape(N, C, H, W)


def mirrow_transform(data, enable_mirror=True, rng=None):
    """Forward pass of MirrowTransform: flips data['X'] and data['Y'] along a random subset
    of the last three axes (same subset for both tensors).

    NOTE: the flip pattern is drawn with Python `random` at trace time (mirrors the torch
    module); wrapping this in jax.jit would bake one fixed pattern into the compiled graph.
    """
    if not enable_mirror:
        return data
    rng = rng if rng is not None else random
    axes_to_flip = []
    for axis in [-1, -2, -3]:
        if rng.random() < 0.5:
            axes_to_flip.append(axis)
    if axes_to_flip:
        flip_w = -1 in axes_to_flip
        flip_h = -2 in axes_to_flip
        flip_c = -3 in axes_to_flip
        data = dict(data)
        data["X"] = mirror_flip(data["X"], flip_w, flip_h, flip_c)
        data["Y"] = mirror_flip(data["Y"], flip_w, flip_h, flip_c)
    return data


if __name__ == "__main__":
    import itertools

    key = jax.random.PRNGKey(0)
    kx, ky = jax.random.split(key)
    X = jax.random.normal(kx, (2, 4, 16, 16), dtype=jnp.float32)
    Y = jax.random.normal(ky, (2, 4, 16, 16), dtype=jnp.float32)

    # 1) Exhaustive check of every flip combination against jnp.flip.
    for fw, fh, fc in itertools.product([False, True], repeat=3):
        out = mirror_flip(X, fw, fh, fc)
        jax.block_until_ready(out)
        ax = [a for a, f in ((-1, fw), (-2, fh), (-3, fc)) if f]
        ref = jnp.flip(X, axis=ax) if ax else X
        assert jnp.allclose(out, ref, atol=1e-6), f"mismatch w={fw} h={fh} c={fc}"

    # N == 1 still goes through the blocked lane-dense path.
    X1 = X[:1]
    out1 = mirror_flip(X1, True, True, False)
    jax.block_until_ready(out1)
    assert jnp.allclose(out1, jnp.flip(X1, axis=[-1, -2]), atol=1e-6), "N==1 mismatch"

    # Larger, W-lane-dense shape: multi-chunk grid, copy-only flip_h path, C=3 channel flip.
    Xb = jax.random.normal(key, (2, 3, 32, 128), dtype=jnp.float32)
    for fw, fh, fc in [(True, True, True), (False, True, False), (True, False, True)]:
        outb = mirror_flip(Xb, fw, fh, fc)
        jax.block_until_ready(outb)
        ax = [a for a, f in ((-1, fw), (-2, fh), (-3, fc)) if f]
        assert jnp.allclose(outb, jnp.flip(Xb, axis=ax), atol=1e-6), (fw, fh, fc)

    # bf16 stays on the native bf16 MXU path; 0/1 perms keep the flip exact.
    Xh = X.astype(jnp.bfloat16)
    outh = mirror_flip(Xh, True, True, True)
    jax.block_until_ready(outh)
    assert bool((outh == jnp.flip(Xh, axis=[-1, -2, -3])).all()), "bf16 mismatch"

    # 2) Full forward pass with the module's forward-time randomness.
    rng = random.Random(0)
    out = mirrow_transform({"X": X, "Y": Y}, enable_mirror=True, rng=rng)
    jax.block_until_ready(out["X"])
    jax.block_until_ready(out["Y"])

    rng_ref = random.Random(0)
    ax = [a for a in [-1, -2, -3] if rng_ref.random() < 0.5]
    refX = jnp.flip(X, axis=ax) if ax else X
    refY = jnp.flip(Y, axis=ax) if ax else Y
    assert jnp.allclose(out["X"], refX, atol=1e-6), "X mismatch"
    assert jnp.allclose(out["Y"], refY, atol=1e-6), "Y mismatch"

    print("KERNEL_OK")
</pallas_src>

<mosaic_0001>
module attributes {stable_mosaic.version = 11 : i64} {
  func.func @_left_kernel(%arg0: i32, %arg1: i32, %arg2: memref<8x8xf32, #tpu.memory_space<vmem>>, %arg3: memref<8x256xf32, #tpu.memory_space<vmem>>, %arg4: memref<8x256xf32, #tpu.memory_space<vmem>>) attributes {dimension_semantics = [#tpu.dimension_semantics<parallel>, #tpu.dimension_semantics<parallel>], iteration_bounds = array<i64: 1, 1>, scalar_prefetch = 0 : i64, scratch_operands = 0 : i64, tpu.core_type = #tpu.core_type<tc>, window_params = [{pipeline_mode = #tpu.pipeline_mode<synchronous>, transform_indices = @transform_0, window_bounds = array<i64: 8, 8>}, {transform_indices = @transform_1, window_bounds = array<i64: 8, 256>}, {transform_indices = @transform_2, window_bounds = array<i64: 8, 256>}]} {
    %c0 = arith.constant 0 : index
    %c0_0 = arith.constant 0 : index
    %0 = vector.load %arg2[%c0, %c0_0] : memref<8x8xf32, #tpu.memory_space<vmem>>, vector<8x8xf32>
    %c0_1 = arith.constant 0 : index
    %c0_2 = arith.constant 0 : index
    %1 = vector.load %arg3[%c0_1, %c0_2] : memref<8x256xf32, #tpu.memory_space<vmem>>, vector<8x256xf32>
    %cst = arith.constant dense<0.000000e+00> : vector<8x256xf32>
    %2 = tpu.matmul %0, %1, %cst {dimension_numbers = #tpu.dot_dimension_numbers<[1], [0], [0], [1], [0, 0, 1, 1], [], []>, precision = #tpu.contract_precision<fp32>} : vector<8x8xf32>, vector<8x256xf32>, vector<8x256xf32> -> vector<8x256xf32>
    %c0_3 = arith.constant 0 : index
    %c0_4 = arith.constant 0 : index
    %3 = vector.load %arg4[%c0_3, %c0_4] : memref<8x256xf32, #tpu.memory_space<vmem>>, vector<8x256xf32>
    tpu.vector_store %arg4[%c0_3, %c0_4], %2 {strides = array<i32>} : memref<8x256xf32, #tpu.memory_space<vmem>>, vector<8x256xf32>,
    return
  }
  func.func @transform_0(%arg0: i32, %arg1: i32) -> (i32, i32) {
    %c0_i32 = arith.constant 0 : i32
    %c0_i32_0 = arith.constant 0 : i32
    %c0_i32_1 = arith.constant 0 : i32
    return %c0_i32, %c0_i32_0 : i32, i32
  }
  func.func @transform_1(%arg0: i32, %arg1: i32) -> (i32, i32) {
    %c0_i32 = arith.constant 0 : i32
    return %arg0, %arg1 : i32, i32
  }
  func.func @transform_2(%arg0: i32, %arg1: i32) -> (i32, i32) {
    %c0_i32 = arith.constant 0 : i32
    return %arg0, %arg1 : i32, i32
  }
}

</mosaic_0001>

<bundles_post_ra>
// kernel: tpu_custom_call.1
= control target key start
LH: loop header
LB: loop body
LE: loop exit
PB: predicated region body
PF: predicated region fallthrough
CT: control target
= control target key end

     0   :  { %7 = vsyncpa [#allocation3], 0  ;;  %s624_s0 = inlined_call_operand.hbm [shape: f32[8,8], index: 0, kind: input, shape index: {}]   ;;  %s625_s1 = inlined_call_operand.hbm [shape: f32[8,256], index: 1, kind: input, shape index: {}]   ;;  %s626_s2 = inlined_call_operand.hbm [shape: f32[8,256], index: 2, kind: output, shape index: {}]  }
   0x1   :  { %8 = vsyncpa [#allocation6], 0 }
   0x2   :  { %9 = vsyncpa [#allocation4], 0  ;;  %s596_s9 = smov [#allocation2]   ;;  %s597_s11 = smov [#allocation5]  }
   0x3   :  { %s16_s10 = sshll.u32 %s596_s9, 4  ;;  %s26_s12 = sshll.u32 %s597_s11, 4  ;;  %s17_s10 = int_to_ptr.vmem [resolvable:$true] %s16_s10  ;;  %s27_s12 = int_to_ptr.vmem [resolvable:$true] %s26_s12 }
   0x4   :  { %s538_s13 = scalar_lea.vmem %s17_s10, 128  ;;  %p543_p1 = scmp.lt.s32.totalorder %s17_s10, %s17_s10 }
   0x5   :  { %p539_p0 = scmp.ne.s32.totalorder %s17_s10, %s538_s13  ;;  %p544_p2 = scmp.lt.s32.totalorder %s538_s13, %s538_s13 }
   0x7   :  { %p545_p3 = por %p544_p2, %p543_p1 }
   0x9   :  { %p546_p4 = pnand %p545_p3, %p539_p0 }
   0xb   :  { %549 = shalt.err (!%p546_p4)
}
   0xc   :  { %19 = dma.hbm_to_vmem [thread:$0]  %s624_s0, 128, %s17_s10, [#allocation3]  }
   0xd   :  { %s558_s16 = scalar_lea.vmem %s27_s12, 256  ;;  %p563_p6 = scmp.lt.s32.totalorder %s27_s12, %s27_s12 }
   0xe   :  { %p559_p5 = scmp.ne.s32.totalorder %s27_s12, %s558_s16  ;;  %p564_p7 = scmp.lt.s32.totalorder %s558_s16, %s558_s16 }
  0x10   :  { %p565_p8 = por %p564_p7, %p563_p6 }
  0x12   :  { %p566_p9 = pnand %p565_p8, %p559_p5 }
  0x14   :  { %569 = shalt.err (!%p566_p9)
}
  0x15   :  { %29 = dma.hbm_to_vmem [thread:$0]  %s625_s1, 256, %s27_s12, [#allocation6]  }
  0x16   :  { %590 = dma.done.wait [#allocation3], 128  }
  0x17   :  { %591 = vsyncadd [#allocation3], 4294967168 }
  0x18   :  { %592 = dma.done.wait [#allocation6], 256  }
  0x19   :  { %593 = vsyncadd [#allocation6], 4294967040  ;;  %v598_v0 = vmov 0.0   ;;  %vm39_vm0 = vcmask 64512   ;;  %v38_v1 = vld [vmem:[#allocation5 + $0x8] sm:$0xff]  ;;  %v37_v2 = vld [vmem:[#allocation5] sm:$0xff] }
  0x1a   :  { %109 = vmatprep.mubr.f32.mxu0 %v598_v0  ;;  %195 = vmatprep.mubr.f32.mxu1 %v598_v0  ;;  %v36_v3 = vld [vmem:[#allocation2] sm:$0xff]  ;;  %v73_v4 = vand.u32 4294901760, %v38_v1  ;;  %v75_v5 = vand.u32 4294901760, %v37_v2  ;;  %s599_s0 = smov [#allocation7]  }
  0x1b   :  { %v41_v6 = vsel %vm39_vm0, %v36_v3, 0  ;;  %s516_s1 = sshll.u32 %s599_s0, 4  ;;  %s517_s1 = int_to_ptr.vmem [resolvable:$true] %s516_s1 }
  0x1c   :  { %v110_v7 = vand.u32 4294901760, %v41_v6  ;;  %74 = vmatprep.subr.mxu0 %v73_v4  ;;  %v152_v8 = vsub.f32 %v38_v1, %v73_v4  ;;  %v158_v9 = vsub.f32 %v37_v2, %v75_v5  ;;  %s570_s19 = scalar_lea.vmem %s517_s1, 256  ;;  %p575_p11 = scmp.lt.s32.totalorder %s517_s1, %s517_s1 }
  0x1d   :  { %76 = vmatpush1.msra.mxu0 %v75_v5  ;;  %p571_p10 = scmp.ne.s32.totalorder %s517_s1, %s570_s19  ;;  %p576_p12 = scmp.lt.s32.totalorder %s570_s19, %s570_s19 }
  0x1e   :  { %v111_v10 = vsub.f32 %v41_v6, %v110_v7  ;;  %v153_v11 = vand.u32 4294901760, %v152_v8  ;;  %235 = vmatprep.subr.mxu0 %v152_v8  ;;  %v159_v12 = vand.u32 4294901760, %v158_v9 }
  0x1f   :  { %p577_p13 = por %p576_p12, %p575_p11 }
  0x20   :  { %v112_v13 = vand.u32 4294901760, %v111_v10  ;;  %v154_v14 = vsub.f32 %v152_v8, %v153_v11  ;;  %v160_v15 = vsub.f32 %v158_v9, %v159_v12 }
  0x21   :  { %p578_p0 = pnand %p577_p13, %p571_p10 }
  0x22   :  { %v113_v16 = vsub.f32 %v111_v10, %v112_v13  ;;  %v155_v17 = vand.u32 4294901760, %v154_v14  ;;  %v161_v18 = vand.u32 4294901760, %v160_v15 }
  0x24   :  { %v114_v19 = vand.u32 4294901760, %v113_v16  ;;  %156 = vmatprep.subr.mxu1 %v155_v17 }
  0x25   :  { %162 = vmatpush1.msra.mxu1 %v161_v18 }
  0x26   :  { %115 = vmatmul.mubr.f32.vlgmr.msra.gmra.mxu0 %v114_v19  ;;  %197 = vmatmul.mubr.f32.vlgmr.msra.gmra.mxu1 %v110_v7 }
  0x27   :  { %238 = vmatpush1.msra.mxu0 %v158_v9  ;;  %311 = vmatprep.subr.mxu1 %v73_v4 }
  0x28   :  { %271 = vmatprep.mubr.f32.mxu0 %v598_v0  ;;  %313 = vmatpush1.msra.mxu1 %v75_v5 }
  0x29   :  { %389 = vmatprep.subr.mxu0 %v153_v11  ;;  %346 = vmatprep.mubr.f32.mxu1 %v598_v0 }
  0x2a   :  { %274 = vmatmul.mubr.f32.vlgmr.msra.gmra.mxu0 %v111_v10  ;;  %350 = vmatmul.mubr.f32.vlgmr.msra.gmra.mxu1 %v112_v13 }
  0x2b   :  { %393 = vmatpush1.msra.mxu0 %v159_v12  ;;  %465 = vmatprep.subr.mxu1 %v73_v4 }
  0x2c   :  { %426 = vmatprep.mubr.f32.mxu0 %v598_v0  ;;  %467 = vmatpush1.msra.mxu1 %v75_v5 }
  0x2d   :  { %500 = vmatprep.mubr.f32.mxu1 %v598_v0 }
  0x2e   :  { %428 = vmatmul.mubr.f32.vlgmr.msra.gmra.mxu0 %v110_v7  ;;  %502 = vmatmul.mubr.f32.vlgmr.msra.gmra.mxu1 %v110_v7 }
  0xe6   :  { %v116_v20 = vpop.f32.mrf.mxu0  ;;  %v198_v21 = vpop.f32.mrf.mxu1 }
  0xe7   :  { %v199_v22 = vadd.f32 %v198_v21, %v116_v20 }
  0xe8   :  { %v118_v23 = vpop.f32.mrf.mxu0  ;;  %v200_v24 = vpop.f32.mrf.mxu1 }
  0xe9   :  { %v201_v25 = vadd.f32 %v200_v24, %v118_v23 }
  0xea   :  { %v275_v26 = vpop.f32.mrf.mxu0  ;;  %v351_v28 = vpop.f32.mrf.mxu1 }
  0xeb   :  { %v276_v27 = vadd.f32 %v275_v26, %v199_v22 }
  0xec   :  { %v277_v29 = vpop.f32.mrf.mxu0  ;;  %v353_v32 = vpop.f32.mrf.mxu1 }
  0xed   :  { %v352_v30 = vadd.f32 %v351_v28, %v276_v27  ;;  %v278_v31 = vadd.f32 %v277_v29, %v201_v25 }
  0xee   :  { %v429_v33 = vpop.f32.mrf.mxu0  ;;  %v503_v36 = vpop.f32.mrf.mxu1 }
  0xef   :  { %v354_v34 = vadd.f32 %v353_v32, %v278_v31  ;;  %v430_v35 = vadd.f32 %v429_v33, %v352_v30 }
  0xf0   :  { %v431_v37 = vpop.f32.mrf.mxu0  ;;  %v505_v40 = vpop.f32.mrf.mxu1 }
  0xf1   :  { %v504_v38 = vadd.f32 %v503_v36, %v430_v35  ;;  %v432_v39 = vadd.f32 %v431_v37, %v354_v34 }
  0xf3   :  { %508 = vst [vmem:[#allocation7] sm:$0xff] %v504_v38  ;;  %v506_v41 = vadd.f32 %v505_v40, %v432_v39 }
  0xf5   :  { %509 = vst [vmem:[#allocation7 + $0x8] sm:$0xff] %v506_v41 }
  0xf6   :  { %581 = shalt.err (!%p578_p0)
}
  0xf7   :  { %519 = dma.vmem_to_hbm [thread:$0]  %s517_s1, 256, %s626_s2, [#allocation4]  }
  0xf8   :  { %594 = dma.done.wait [#allocation4], 256  }
  0xf9   :  { %595 = vsyncadd [#allocation4], 4294967040 }
  0xfa   :  { %523 = vsyncpa [#allocation3], 1 }
  0xfb   :  { %524 = vsyncpa [#allocation6], 1 }
  0xfc   :  { %525 = vsyncpa [#allocation4], 1 }

</bundles_post_ra>
